<compile_context>
chip_gen: v5e
topology: v5e:2x2
jax: 0.10.0
libtpu: 0.0.40
codegen_flags: <defaults>
</compile_context>

<pallas_src>
import functools

import jax
import jax.numpy as jnp
import numpy as np
from jax import lax
from jax.experimental import pallas as pl
from jax.experimental.pallas import tpu as pltpu

BN_EPS = 1e-5  # PyTorch BatchNorm2d default eps


def pwblock_kernel(x_in_ref, x_tail_ref, s1_ref, b1_ref, w1_ref, s2_ref,
                   b2_ref, w2_ref, res_ref, otail_ref, *, H, W, G, OC, TB):
    # x_in_ref  : (TB, Gp, HW)    x[:, inplanes:outplanes], channels padded to Gp
    # x_tail_ref: (TB, OC-G, HW)  x[:, outplanes:]
    # s*/b*_ref : (Gp, 1)         folded BN scale/bias
    # w1_ref    : (Gp, 9*Gp)      bf16 conv1 weights, [co, k*Gp + ci], k = dh*3+dw
    # w2_ref    : (OC, Gp)        bf16 conv2 (1x1) weights, transposed
    # res_ref   : (TB, OC-G, HW)  x_tail + conv2(...)[:OC-G]   (residual fused)
    # otail_ref : (TB, G, HW)     conv2(...)[OC-G:]
    HW = H * W
    R = OC - G

    # 3x3 tap table: flat lane offset + validity mask for pixels whose source
    # lies in Conv2d's zero padding.  Depends only on lane position -> hoisted.
    lane = lax.broadcasted_iota(jnp.int32, (1, HW), 1)
    col = lane % W
    taps = []
    for dh in range(3):
        for dw in range(3):
            ry, rx = dh - 1, dw - 1
            conds = []
            if ry == -1:
                conds.append(lane >= W)
            elif ry == 1:
                conds.append(lane < (H - 1) * W)
            if rx == -1:
                conds.append(col != 0)
            elif rx == 1:
                conds.append(col != (W - 1))
            mask = None
            for c in conds:
                mask = c if mask is None else (mask & c)
            taps.append((ry * W + rx, mask))

    # hoist per-channel scale/bias and weights out of the per-image loop
    s1 = s1_ref[...]
    b1 = b1_ref[...]
    s2 = s2_ref[...]
    b2 = b2_ref[...]
    w1 = w1_ref[...]
    w2 = w2_ref[...]

    for tb in range(TB):                          # static, unrolled
        x = x_in_ref[tb]                          # (Gp, HW)
        a = jnp.maximum(x * s1 + b1, 0.0)         # bn1 (folded) + relu

        # im2col: 9 lane-rotated + border-masked copies stacked on sublanes.
        # shifted[l] = a[(l + off) mod HW]; wrapped / out-of-image lanes are
        # exactly the masked ones, reproducing the zero padding.
        pieces = []
        for off, mask in taps:
            r = a if off == 0 else pltpu.roll(a, (-off) % HW, 1)
            pieces.append(r if mask is None else jnp.where(mask, r, 0.0))
        patches = jnp.concatenate(pieces, axis=0).astype(jnp.bfloat16)  # (9Gp,HW)

        # conv1 3x3 as one MXU matmul (K = 9*Gp), f32 accumulation
        y1 = jnp.dot(w1, patches, preferred_element_type=jnp.float32)   # (Gp,HW)

        # bn2 (folded) + relu, then conv2 1x1 as one MXU matmul
        a2 = jnp.maximum(y1 * s2 + b2, 0.0).astype(jnp.bfloat16)
        out = jnp.dot(w2, a2, preferred_element_type=jnp.float32)       # (OC,HW)

        res_ref[tb] = x_tail_ref[tb] + out[:R, :]
        otail_ref[tb] = out[R:, :]


def pwblock_forward(x_nchw, params, *, num_rank, group_channels, out_channels,
                    images_per_block=None):
    N, C, H, W = x_nchw.shape
    G, OC = group_channels, out_channels
    HW = H * W
    inplanes = num_rank * G
    outplanes = inplanes + G
    # residual arithmetic in the torch module implies C == inplanes + OC
    assert C == inplanes + OC, "PWBlock requires C == num_rank*G + out_channels"

    # images per grid step: batch work per step, but keep >= 2 grid steps when
    # possible so both v7x TensorCores are busy on the 'parallel' axis.
    if images_per_block is None:
        TB = 1
        for cand in (8, 4, 2):
            if N % cand == 0 and N // cand >= 2:
                TB = cand
                break
    else:
        TB = images_per_block
    assert N % TB == 0

    Gp = -(-G // 8) * 8                          # pad channels to sublane tile

    x = x_nchw.astype(jnp.float32)
    x_in = x[:, inplanes:outplanes].reshape(N, G, HW)
    x_tail = x[:, outplanes:].reshape(N, OC - G, HW)

    # fold BN (inference mode) into per-channel scale/bias
    s1 = params["gamma1"] / jnp.sqrt(params["var1"] + BN_EPS)
    b1 = params["beta1"] - params["mean1"] * s1
    s2 = params["gamma2"] / jnp.sqrt(params["var2"] + BN_EPS)
    b2 = params["beta2"] - params["mean2"] * s2

    # conv1 HWIO (3,3,G,G) -> (G_out, 3, 3, G_in); conv2 (G, OC) -> (OC, G)
    w1 = jnp.transpose(params["w1"], (3, 0, 1, 2))
    w2t = params["w2"].T
    if Gp != G:
        pad = Gp - G
        x_in = jnp.pad(x_in, ((0, 0), (0, pad), (0, 0)))
        s1 = jnp.pad(s1, (0, pad))
        b1 = jnp.pad(b1, (0, pad))
        s2 = jnp.pad(s2, (0, pad))
        b2 = jnp.pad(b2, (0, pad))
        w1 = jnp.pad(w1, ((0, pad), (0, 0), (0, 0), (0, pad)))
        w2t = jnp.pad(w2t, ((0, 0), (0, pad)))
    w1cat = w1.reshape(Gp, 9 * Gp).astype(jnp.bfloat16)   # [co, k*Gp + ci]
    w2t = w2t.astype(jnp.bfloat16)                         # (OC, Gp)

    kernel = functools.partial(pwblock_kernel, H=H, W=W, G=G, OC=OC, TB=TB)
    res, out_tail = pl.pallas_call(
        kernel,
        grid=(N // TB,),
        in_specs=[
            pl.BlockSpec((TB, Gp, HW), lambda b: (b, 0, 0)),
            pl.BlockSpec((TB, OC - G, HW), lambda b: (b, 0, 0)),
            pl.BlockSpec((Gp, 1), lambda b: (0, 0)),
            pl.BlockSpec((Gp, 1), lambda b: (0, 0)),
            pl.BlockSpec((Gp, 9 * Gp), lambda b: (0, 0)),
            pl.BlockSpec((Gp, 1), lambda b: (0, 0)),
            pl.BlockSpec((Gp, 1), lambda b: (0, 0)),
            pl.BlockSpec((OC, Gp), lambda b: (0, 0)),
        ],
        out_specs=[
            pl.BlockSpec((TB, OC - G, HW), lambda b: (b, 0, 0)),
            pl.BlockSpec((TB, G, HW), lambda b: (b, 0, 0)),
        ],
        out_shape=(
            jax.ShapeDtypeStruct((N, OC - G, HW), jnp.float32),
            jax.ShapeDtypeStruct((N, G, HW), jnp.float32),
        ),
        compiler_params=pltpu.CompilerParams(dimension_semantics=("parallel",)),
    )(x_in, x_tail, s1.reshape(Gp, 1), b1.reshape(Gp, 1), w1cat,
      s2.reshape(Gp, 1), b2.reshape(Gp, 1), w2t)

    res = res.reshape(N, OC - G, H, W)
    out_tail = out_tail.reshape(N, G, H, W)
    # final channel concat; everything stays NCHW so no layout transposes
    return jnp.concatenate([x[:, :outplanes], res, out_tail], axis=1)


def pwblock_reference(x_nchw, params, *, num_rank, group_channels, out_channels):
    """Pure-JAX (XLA conv) reference with identical semantics, for checking."""
    G, OC = group_channels, out_channels
    inplanes = num_rank * G
    outplanes = inplanes + G

    def bn(x, g, b, m, v):
        s = (g / jnp.sqrt(v + BN_EPS))[None, :, None, None]
        return (x - m[None, :, None, None]) * s + b[None, :, None, None]

    inputs = x_nchw[:, inplanes:outplanes]
    a = jax.nn.relu(bn(inputs, params["gamma1"], params["beta1"],
                       params["mean1"], params["var1"]))
    out = lax.conv_general_dilated(a, params["w1"], (1, 1), "SAME",
                                   dimension_numbers=("NCHW", "HWIO", "NCHW"))
    a2 = jax.nn.relu(bn(out, params["gamma2"], params["beta2"],
                        params["mean2"], params["var2"]))
    out = lax.conv_general_dilated(a2, params["w2"].reshape(1, 1, G, OC),
                                   (1, 1), "SAME",
                                   dimension_numbers=("NCHW", "HWIO", "NCHW"))
    residual = x_nchw[:, outplanes:] + out[:, :OC - G]
    return jnp.concatenate([x_nchw[:, :outplanes], residual, out[:, OC - G:]],
                           axis=1)


if __name__ == "__main__":
    # small deterministic config
    num_rank, G, OC = 2, 4, 12
    N, H, W = 2, 16, 16
    C = num_rank * G + OC            # = 20; required by the residual arithmetic

    key = jax.random.PRNGKey(0)
    keys = jax.random.split(key, 12)
    x = jax.random.normal(keys[0], (N, C, H, W), jnp.float32)
    params = {
        "gamma1": jax.random.uniform(keys[1], (G,), jnp.float32, 0.5, 1.5),
        "beta1": 0.1 * jax.random.normal(keys[2], (G,), jnp.float32),
        "mean1": 0.1 * jax.random.normal(keys[3], (G,), jnp.float32),
        "var1": jax.random.uniform(keys[4], (G,), jnp.float32, 0.5, 1.5),
        "w1": 0.2 * jax.random.normal(keys[5], (3, 3, G, G), jnp.float32),  # HWIO
        "gamma2": jax.random.uniform(keys[6], (G,), jnp.float32, 0.5, 1.5),
        "beta2": 0.1 * jax.random.normal(keys[7], (G,), jnp.float32),
        "mean2": 0.1 * jax.random.normal(keys[8], (G,), jnp.float32),
        "var2": jax.random.uniform(keys[9], (G,), jnp.float32, 0.5, 1.5),
        "w2": 0.2 * jax.random.normal(keys[10], (G, OC), jnp.float32),      # 1x1
    }

    # TODO(synk): dropout path not implemented (module default dropout=0.0 and
    # it references an undefined self.droprate); downsample is unused in forward.

    y = pwblock_forward(x, params, num_rank=num_rank,
                        group_channels=G, out_channels=OC)
    y = jax.block_until_ready(y)

    y_ref = pwblock_reference(x, params, num_rank=num_rank,
                              group_channels=G, out_channels=OC)
    assert y.shape == (N, C + G, H, W), y.shape
    # tolerance accounts for bf16 MXU operands (f32 accumulation)
    np.testing.assert_allclose(np.asarray(y), np.asarray(y_ref),
                               rtol=2e-2, atol=2e-2)
    print("KERNEL_OK")
</pallas_src>

<mosaic_0001>
module attributes {stable_mosaic.version = 11 : i64} {
  func.func @pwblock_kernel(%arg0: i32, %arg1: memref<1x8x256xf32, #tpu.memory_space<vmem>>, %arg2: memref<1x8x256xf32, #tpu.memory_space<vmem>>, %arg3: memref<8x1xf32, #tpu.memory_space<vmem>>, %arg4: memref<8x1xf32, #tpu.memory_space<vmem>>, %arg5: memref<8x72xbf16, #tpu.memory_space<vmem>>, %arg6: memref<8x1xf32, #tpu.memory_space<vmem>>, %arg7: memref<8x1xf32, #tpu.memory_space<vmem>>, %arg8: memref<12x8xbf16, #tpu.memory_space<vmem>>, %arg9: memref<1x8x256xf32, #tpu.memory_space<vmem>>, %arg10: memref<1x4x256xf32, #tpu.memory_space<vmem>>) attributes {dimension_semantics = [#tpu.dimension_semantics<parallel>], iteration_bounds = array<i64: 2>, scalar_prefetch = 0 : i64, scratch_operands = 0 : i64, tpu.core_type = #tpu.core_type<tc>, window_params = [{transform_indices = @transform_0, window_bounds = array<i64: 1, 8, 256>}, {transform_indices = @transform_1, window_bounds = array<i64: 1, 8, 256>}, {pipeline_mode = #tpu.pipeline_mode<synchronous>, transform_indices = @transform_2, window_bounds = array<i64: 8, 1>}, {pipeline_mode = #tpu.pipeline_mode<synchronous>, transform_indices = @transform_3, window_bounds = array<i64: 8, 1>}, {pipeline_mode = #tpu.pipeline_mode<synchronous>, transform_indices = @transform_4, window_bounds = array<i64: 8, 72>}, {pipeline_mode = #tpu.pipeline_mode<synchronous>, transform_indices = @transform_5, window_bounds = array<i64: 8, 1>}, {pipeline_mode = #tpu.pipeline_mode<synchronous>, transform_indices = @transform_6, window_bounds = array<i64: 8, 1>}, {pipeline_mode = #tpu.pipeline_mode<synchronous>, transform_indices = @transform_7, window_bounds = array<i64: 12, 8>}, {transform_indices = @transform_8, window_bounds = array<i64: 1, 8, 256>}, {transform_indices = @transform_9, window_bounds = array<i64: 1, 4, 256>}]} {
    %0 = tpu.iota {dimensions = array<i32: 1>} : vector<1x256xi32>
    %c16_i32 = arith.constant 16 : i32
    %c0_i32 = arith.constant 0 : i32
    %1 = arith.cmpi eq, %c16_i32, %c0_i32 : i32
    %c1_i32 = arith.constant 1 : i32
    %2 = arith.select %1, %c1_i32, %c16_i32 : i32
    %3 = vector.broadcast %2 : i32 to vector<1x256xi32>
    %4 = arith.remsi %0, %3 : vector<1x256xi32>
    %c0_i32_0 = arith.constant 0 : i32
    %5 = vector.broadcast %c0_i32_0 : i32 to vector<1x256xi32>
    %6 = arith.cmpi ne, %4, %5 : vector<1x256xi32>
    %c0_i32_1 = arith.constant 0 : i32
    %7 = vector.broadcast %c0_i32_1 : i32 to vector<1x256xi32>
    %8 = arith.cmpi slt, %4, %7 : vector<1x256xi32>
    %c0_i32_2 = arith.constant 0 : i32
    %9 = arith.cmpi slt, %2, %c0_i32_2 : i32
    %10 = vector.broadcast %9 : i1 to vector<1x256xi1>
    %11 = vector.broadcast %10 : vector<1x256xi1> to vector<1x256xi1>
    %12 = arith.xori %8, %11 : vector<1x256xi1>
    %13 = arith.andi %12, %6 : vector<1x256xi1>
    %14 = vector.broadcast %2 : i32 to vector<1x256xi32>
    %15 = arith.addi %4, %14 : vector<1x256xi32>
    %16 = arith.select %13, %15, %4 : vector<1x256xi1>, vector<1x256xi32>
    %c16_i32_3 = arith.constant 16 : i32
    %17 = vector.broadcast %c16_i32_3 : i32 to vector<1x256xi32>
    %18 = arith.cmpi sge, %0, %17 : vector<1x256xi32>
    %c0_i32_4 = arith.constant 0 : i32
    %19 = vector.broadcast %c0_i32_4 : i32 to vector<1x256xi32>
    %20 = arith.cmpi ne, %16, %19 : vector<1x256xi32>
    %21 = arith.andi %18, %20 : vector<1x256xi1>
    %c16_i32_5 = arith.constant 16 : i32
    %22 = vector.broadcast %c16_i32_5 : i32 to vector<1x256xi32>
    %23 = arith.cmpi sge, %0, %22 : vector<1x256xi32>
    %c16_i32_6 = arith.constant 16 : i32
    %24 = vector.broadcast %c16_i32_6 : i32 to vector<1x256xi32>
    %25 = arith.cmpi sge, %0, %24 : vector<1x256xi32>
    %c15_i32 = arith.constant 15 : i32
    %26 = vector.broadcast %c15_i32 : i32 to vector<1x256xi32>
    %27 = arith.cmpi ne, %16, %26 : vector<1x256xi32>
    %28 = arith.andi %25, %27 : vector<1x256xi1>
    %c0_i32_7 = arith.constant 0 : i32
    %29 = vector.broadcast %c0_i32_7 : i32 to vector<1x256xi32>
    %30 = arith.cmpi ne, %16, %29 : vector<1x256xi32>
    %c15_i32_8 = arith.constant 15 : i32
    %31 = vector.broadcast %c15_i32_8 : i32 to vector<1x256xi32>
    %32 = arith.cmpi ne, %16, %31 : vector<1x256xi32>
    %c240_i32 = arith.constant 240 : i32
    %33 = vector.broadcast %c240_i32 : i32 to vector<1x256xi32>
    %34 = arith.cmpi slt, %0, %33 : vector<1x256xi32>
    %c0_i32_9 = arith.constant 0 : i32
    %35 = vector.broadcast %c0_i32_9 : i32 to vector<1x256xi32>
    %36 = arith.cmpi ne, %16, %35 : vector<1x256xi32>
    %37 = arith.andi %34, %36 : vector<1x256xi1>
    %c240_i32_10 = arith.constant 240 : i32
    %38 = vector.broadcast %c240_i32_10 : i32 to vector<1x256xi32>
    %39 = arith.cmpi slt, %0, %38 : vector<1x256xi32>
    %c240_i32_11 = arith.constant 240 : i32
    %40 = vector.broadcast %c240_i32_11 : i32 to vector<1x256xi32>
    %41 = arith.cmpi slt, %0, %40 : vector<1x256xi32>
    %c15_i32_12 = arith.constant 15 : i32
    %42 = vector.broadcast %c15_i32_12 : i32 to vector<1x256xi32>
    %43 = arith.cmpi ne, %16, %42 : vector<1x256xi32>
    %44 = arith.andi %41, %43 : vector<1x256xi1>
    %c0 = arith.constant 0 : index
    %c0_13 = arith.constant 0 : index
    %45 = vector.load %arg3[%c0, %c0_13] : memref<8x1xf32, #tpu.memory_space<vmem>>, vector<8x1xf32>
    %c0_14 = arith.constant 0 : index
    %c0_15 = arith.constant 0 : index
    %46 = vector.load %arg4[%c0_14, %c0_15] : memref<8x1xf32, #tpu.memory_space<vmem>>, vector<8x1xf32>
    %c0_16 = arith.constant 0 : index
    %c0_17 = arith.constant 0 : index
    %47 = vector.load %arg6[%c0_16, %c0_17] : memref<8x1xf32, #tpu.memory_space<vmem>>, vector<8x1xf32>
    %c0_18 = arith.constant 0 : index
    %c0_19 = arith.constant 0 : index
    %48 = vector.load %arg7[%c0_18, %c0_19] : memref<8x1xf32, #tpu.memory_space<vmem>>, vector<8x1xf32>
    %c0_20 = arith.constant 0 : index
    %c0_21 = arith.constant 0 : index
    %49 = vector.load %arg5[%c0_20, %c0_21] : memref<8x72xbf16, #tpu.memory_space<vmem>>, vector<8x72xbf16>
    %c0_22 = arith.constant 0 : index
    %c0_23 = arith.constant 0 : index
    %50 = vector.load %arg8[%c0_22, %c0_23] : memref<12x8xbf16, #tpu.memory_space<vmem>>, vector<12x8xbf16>
    %c0_24 = arith.constant 0 : index
    %c0_25 = arith.constant 0 : index
    %c0_26 = arith.constant 0 : index
    %51 = vector.load %arg1[%c0_24, %c0_25, %c0_26] : memref<1x8x256xf32, #tpu.memory_space<vmem>>, vector<1x8x256xf32>
    %52 = vector.shape_cast %51 : vector<1x8x256xf32> to vector<8x256xf32>
    %53 = vector.broadcast %45 : vector<8x1xf32> to vector<8x256xf32>
    %54 = arith.mulf %52, %53 : vector<8x256xf32>
    %55 = vector.broadcast %46 : vector<8x1xf32> to vector<8x256xf32>
    %56 = arith.addf %54, %55 : vector<8x256xf32>
    %cst = arith.constant 0.000000e+00 : f32
    %57 = vector.broadcast %cst : f32 to vector<8x256xf32>
    %58 = arith.maximumf %56, %57 : vector<8x256xf32>
    %c17_i32 = arith.constant 17 : i32
    %59 = tpu.dynamic_rotate %58 by %c17_i32 dim 1 : vector<8x256xf32>, i32 -> vector<8x256xf32>
    %cst_27 = arith.constant 0.000000e+00 : f32
    %60 = vector.shape_cast %21 : vector<1x256xi1> to vector<1x256xi1>
    %61 = vector.broadcast %60 : vector<1x256xi1> to vector<8x256xi1>
    %62 = vector.broadcast %cst_27 : f32 to vector<8x256xf32>
    %63 = arith.select %61, %59, %62 : vector<8x256xi1>, vector<8x256xf32>
    %c16_i32_28 = arith.constant 16 : i32
    %64 = tpu.dynamic_rotate %58 by %c16_i32_28 dim 1 : vector<8x256xf32>, i32 -> vector<8x256xf32>
    %cst_29 = arith.constant 0.000000e+00 : f32
    %65 = vector.shape_cast %23 : vector<1x256xi1> to vector<1x256xi1>
    %66 = vector.broadcast %65 : vector<1x256xi1> to vector<8x256xi1>
    %67 = vector.broadcast %cst_29 : f32 to vector<8x256xf32>
    %68 = arith.select %66, %64, %67 : vector<8x256xi1>, vector<8x256xf32>
    %c15_i32_30 = arith.constant 15 : i32
    %69 = tpu.dynamic_rotate %58 by %c15_i32_30 dim 1 : vector<8x256xf32>, i32 -> vector<8x256xf32>
    %cst_31 = arith.constant 0.000000e+00 : f32
    %70 = vector.shape_cast %28 : vector<1x256xi1> to vector<1x256xi1>
    %71 = vector.broadcast %70 : vector<1x256xi1> to vector<8x256xi1>
    %72 = vector.broadcast %cst_31 : f32 to vector<8x256xf32>
    %73 = arith.select %71, %69, %72 : vector<8x256xi1>, vector<8x256xf32>
    %c1_i32_32 = arith.constant 1 : i32
    %74 = tpu.dynamic_rotate %58 by %c1_i32_32 dim 1 : vector<8x256xf32>, i32 -> vector<8x256xf32>
    %cst_33 = arith.constant 0.000000e+00 : f32
    %75 = vector.shape_cast %30 : vector<1x256xi1> to vector<1x256xi1>
    %76 = vector.broadcast %75 : vector<1x256xi1> to vector<8x256xi1>
    %77 = vector.broadcast %cst_33 : f32 to vector<8x256xf32>
    %78 = arith.select %76, %74, %77 : vector<8x256xi1>, vector<8x256xf32>
    %c255_i32 = arith.constant 255 : i32
    %79 = tpu.dynamic_rotate %58 by %c255_i32 dim 1 : vector<8x256xf32>, i32 -> vector<8x256xf32>
    %cst_34 = arith.constant 0.000000e+00 : f32
    %80 = vector.shape_cast %32 : vector<1x256xi1> to vector<1x256xi1>
    %81 = vector.broadcast %80 : vector<1x256xi1> to vector<8x256xi1>
    %82 = vector.broadcast %cst_34 : f32 to vector<8x256xf32>
    %83 = arith.select %81, %79, %82 : vector<8x256xi1>, vector<8x256xf32>
    %c241_i32 = arith.constant 241 : i32
    %84 = tpu.dynamic_rotate %58 by %c241_i32 dim 1 : vector<8x256xf32>, i32 -> vector<8x256xf32>
    %cst_35 = arith.constant 0.000000e+00 : f32
    %85 = vector.shape_cast %37 : vector<1x256xi1> to vector<1x256xi1>
    %86 = vector.broadcast %85 : vector<1x256xi1> to vector<8x256xi1>
    %87 = vector.broadcast %cst_35 : f32 to vector<8x256xf32>
    %88 = arith.select %86, %84, %87 : vector<8x256xi1>, vector<8x256xf32>
    %c240_i32_36 = arith.constant 240 : i32
    %89 = tpu.dynamic_rotate %58 by %c240_i32_36 dim 1 : vector<8x256xf32>, i32 -> vector<8x256xf32>
    %cst_37 = arith.constant 0.000000e+00 : f32
    %90 = vector.shape_cast %39 : vector<1x256xi1> to vector<1x256xi1>
    %91 = vector.broadcast %90 : vector<1x256xi1> to vector<8x256xi1>
    %92 = vector.broadcast %cst_37 : f32 to vector<8x256xf32>
    %93 = arith.select %91, %89, %92 : vector<8x256xi1>, vector<8x256xf32>
    %c239_i32 = arith.constant 239 : i32
    %94 = tpu.dynamic_rotate %58 by %c239_i32 dim 1 : vector<8x256xf32>, i32 -> vector<8x256xf32>
    %cst_38 = arith.constant 0.000000e+00 : f32
    %95 = vector.shape_cast %44 : vector<1x256xi1> to vector<1x256xi1>
    %96 = vector.broadcast %95 : vector<1x256xi1> to vector<8x256xi1>
    %97 = vector.broadcast %cst_38 : f32 to vector<8x256xf32>
    %98 = arith.select %96, %94, %97 : vector<8x256xi1>, vector<8x256xf32>
    %99 = tpu.concatenate %63, %68, %73, %78, %58, %83, %88, %93, %98 in 0 : vector<8x256xf32>, vector<8x256xf32>, vector<8x256xf32>, vector<8x256xf32>, vector<8x256xf32>, vector<8x256xf32>, vector<8x256xf32>, vector<8x256xf32>, vector<8x256xf32> -> vector<72x256xf32>
    %100 = arith.truncf %99 : vector<72x256xf32> to vector<72x256xbf16>
    %cst_39 = arith.constant dense<0.000000e+00> : vector<8x256xf32>
    %101 = tpu.matmul %49, %100, %cst_39 {dimension_numbers = #tpu.dot_dimension_numbers<[1], [0], [0], [1], [0, 0, 1, 1], [], []>} : vector<8x72xbf16>, vector<72x256xbf16>, vector<8x256xf32> -> vector<8x256xf32>
    %102 = vector.broadcast %47 : vector<8x1xf32> to vector<8x256xf32>
    %103 = arith.mulf %101, %102 : vector<8x256xf32>
    %104 = vector.broadcast %48 : vector<8x1xf32> to vector<8x256xf32>
    %105 = arith.addf %103, %104 : vector<8x256xf32>
    %cst_40 = arith.constant 0.000000e+00 : f32
    %106 = vector.broadcast %cst_40 : f32 to vector<8x256xf32>
    %107 = arith.maximumf %105, %106 : vector<8x256xf32>
    %108 = arith.truncf %107 : vector<8x256xf32> to vector<8x256xbf16>
    %cst_41 = arith.constant dense<0.000000e+00> : vector<12x256xf32>
    %109 = tpu.matmul %50, %108, %cst_41 {dimension_numbers = #tpu.dot_dimension_numbers<[1], [0], [0], [1], [0, 0, 1, 1], [], []>} : vector<12x8xbf16>, vector<8x256xbf16>, vector<12x256xf32> -> vector<12x256xf32>
    %c0_42 = arith.constant 0 : index
    %c0_43 = arith.constant 0 : index
    %c0_44 = arith.constant 0 : index
    %110 = vector.load %arg2[%c0_42, %c0_43, %c0_44] : memref<1x8x256xf32, #tpu.memory_space<vmem>>, vector<1x8x256xf32>
    %111 = vector.shape_cast %110 : vector<1x8x256xf32> to vector<8x256xf32>
    %112 = vector.extract_strided_slice %109 {offsets = [0, 0], sizes = [8, 256], strides = [1, 1]} : vector<12x256xf32> to vector<8x256xf32>
    %113 = arith.addf %111, %112 : vector<8x256xf32>
    %c0_45 = arith.constant 0 : index
    %c0_46 = arith.constant 0 : index
    %c0_47 = arith.constant 0 : index
    %114 = vector.load %arg9[%c0_45, %c0_46, %c0_47] : memref<1x8x256xf32, #tpu.memory_space<vmem>>, vector<1x8x256xf32>
    %115 = vector.shape_cast %114 : vector<1x8x256xf32> to vector<8x256xf32>
    %116 = vector.shape_cast %113 : vector<8x256xf32> to vector<1x8x256xf32>
    tpu.vector_store %arg9[%c0_45, %c0_46, %c0_47], %116 {strides = array<i32>} : memref<1x8x256xf32, #tpu.memory_space<vmem>>, vector<1x8x256xf32>,
    %117 = vector.extract_strided_slice %109 {offsets = [8, 0], sizes = [4, 256], strides = [1, 1]} : vector<12x256xf32> to vector<4x256xf32>
    %c0_48 = arith.constant 0 : index
    %c0_49 = arith.constant 0 : index
    %c0_50 = arith.constant 0 : index
    %118 = vector.load %arg10[%c0_48, %c0_49, %c0_50] : memref<1x4x256xf32, #tpu.memory_space<vmem>>, vector<1x4x256xf32>
    %119 = vector.shape_cast %118 : vector<1x4x256xf32> to vector<4x256xf32>
    %120 = vector.shape_cast %117 : vector<4x256xf32> to vector<1x4x256xf32>
    tpu.vector_store %arg10[%c0_48, %c0_49, %c0_50], %120 {strides = array<i32>} : memref<1x4x256xf32, #tpu.memory_space<vmem>>, vector<1x4x256xf32>,
    return
  }
  func.func @transform_0(%arg0: i32) -> (i32, i32, i32) {
    %c0_i32 = arith.constant 0 : i32
    %c0_i32_0 = arith.constant 0 : i32
    %c0_i32_1 = arith.constant 0 : i32
    return %arg0, %c0_i32, %c0_i32_0 : i32, i32, i32
  }
  func.func @transform_1(%arg0: i32) -> (i32, i32, i32) {
    %c0_i32 = arith.constant 0 : i32
    %c0_i32_0 = arith.constant 0 : i32
    %c0_i32_1 = arith.constant 0 : i32
    return %arg0, %c0_i32, %c0_i32_0 : i32, i32, i32
  }
  func.func @transform_2(%arg0: i32) -> (i32, i32) {
    %c0_i32 = arith.constant 0 : i32
    %c0_i32_0 = arith.constant 0 : i32
    %c0_i32_1 = arith.constant 0 : i32
    return %c0_i32, %c0_i32_0 : i32, i32
  }
  func.func @transform_3(%arg0: i32) -> (i32, i32) {
    %c0_i32 = arith.constant 0 : i32
    %c0_i32_0 = arith.constant 0 : i32
    %c0_i32_1 = arith.constant 0 : i32
    return %c0_i32, %c0_i32_0 : i32, i32
  }
  func.func @transform_4(%arg0: i32) -> (i32, i32) {
    %c0_i32 = arith.constant 0 : i32
    %c0_i32_0 = arith.constant 0 : i32
    %c0_i32_1 = arith.constant 0 : i32
    return %c0_i32, %c0_i32_0 : i32, i32
  }
  func.func @transform_5(%arg0: i32) -> (i32, i32) {
    %c0_i32 = arith.constant 0 : i32
    %c0_i32_0 = arith.constant 0 : i32
    %c0_i32_1 = arith.constant 0 : i32
    return %c0_i32, %c0_i32_0 : i32, i32
  }
  func.func @transform_6(%arg0: i32) -> (i32, i32) {
    %c0_i32 = arith.constant 0 : i32
    %c0_i32_0 = arith.constant 0 : i32
    %c0_i32_1 = arith.constant 0 : i32
    return %c0_i32, %c0_i32_0 : i32, i32
  }
  func.func @transform_7(%arg0: i32) -> (i32, i32) {
    %c0_i32 = arith.constant 0 : i32
    %c0_i32_0 = arith.constant 0 : i32
    %c0_i32_1 = arith.constant 0 : i32
    return %c0_i32, %c0_i32_0 : i32, i32
  }
  func.func @transform_8(%arg0: i32) -> (i32, i32, i32) {
    %c0_i32 = arith.constant 0 : i32
    %c0_i32_0 = arith.constant 0 : i32
    %c0_i32_1 = arith.constant 0 : i32
    return %arg0, %c0_i32, %c0_i32_0 : i32, i32, i32
  }
  func.func @transform_9(%arg0: i32) -> (i32, i32, i32) {
    %c0_i32 = arith.constant 0 : i32
    %c0_i32_0 = arith.constant 0 : i32
    %c0_i32_1 = arith.constant 0 : i32
    return %arg0, %c0_i32, %c0_i32_0 : i32, i32, i32
  }
}

</mosaic_0001>

<bundles_post_ra>
// kernel: tpu_custom_call.1
= control target key start
LH: loop header
LB: loop body
LE: loop exit
PB: predicated region body
PF: predicated region fallthrough
CT: control target
= control target key end

     0   :  { %s1566_s0 = inlined_call_operand.hbm [shape: f32[2,8,256], index: 0, kind: input, shape index: {}]   ;;  %s1567_s1 = inlined_call_operand.hbm [shape: f32[2,8,256], index: 1, kind: input, shape index: {}]   ;;  %s1568_s2 = inlined_call_operand.vmem [shape: f32[8,1], index: 2, kind: input, shape index: {}]   ;;  %s1569_s3 = inlined_call_operand.vmem [shape: f32[8,1], index: 3, kind: input, shape index: {}]   ;;  %s1570_s4 = inlined_call_operand.vmem [shape: bf16[8,72], index: 4, kind: input, shape index: {}]   ;;  %s1571_s5 = inlined_call_operand.vmem [shape: f32[8,1], index: 5, kind: input, shape index: {}]   ;;  %s1572_s6 = inlined_call_operand.vmem [shape: f32[8,1], index: 6, kind: input, shape index: {}]   ;;  %s1573_s7 = inlined_call_operand.vmem [shape: bf16[12,8], index: 7, kind: input, shape index: {}]   ;;  %s1574_s8 = inlined_call_operand.hbm [shape: f32[2,8,256], index: 8, kind: output, shape index: {0}]   ;;  %s1575_s9 = inlined_call_operand.hbm [shape: f32[2,4,256], index: 9, kind: output, shape index: {1}]  }
   0x1   :  { %1581 = sst [smem:[#allocation19_spill]] %s1566_s0 }
   0x2   :  { %15 = vsyncpa [#allocation3], 0 }
   0x3   :  { %17 = vsyncpa [#allocation3 + $0x1], 0 }
   0x4   :  { %18 = vsyncpa [#allocation6], 0 }
   0x5   :  { %20 = vsyncpa [#allocation6 + $0x1], 0 }
   0x6   :  { %21 = vsyncpa [#allocation4], 0 }
   0x7   :  { %23 = vsyncpa [#allocation4 + $0x1], 0 }
   0x8   :  { %24 = vsyncpa [#allocation9], 0 }
   0x9   :  { %26 = vsyncpa [#allocation9 + $0x1], 0  ;;  %s1250_s30 = smov 0   ;;  %s1252_s10 = smov 0  }
   0xa   :  { %s1254_s11 = smov 0   ;;  %s1256_s12 = smov 0  }
   0xb LB: > { %1582 = sst [smem:[#allocation14_spill]] %s1176_s30  ;;  %s1271_s13 = sadd.s32 4294967295, %s1188_s12   ;;  %s1188_s12 = sphi %s1256_s12, %s1609_s12   ;;  %s1184_s11 = sphi %s1254_s11, %s1611_s11   ;;  %s1180_s10 = sphi %s1252_s10, %s1613_s10   ;;  %s1176_s30 = sphi %s1250_s30, %s1612_s30  }
   0xc   : > { %1583 = sst [smem:[#allocation15_spill]] %s1184_s11  ;;  %s858_s14 = sadd.s32 4294967294, %s1188_s12  }
   0xd   : > { %s1275_s15 = sadd.s32 1, %s1188_s12   ;;  %s39_s16 = sadd.s32 1, %s1184_s11 }
   0xe   : > { %1584 = sst [smem:[#allocation16_spill]] %s1275_s15  ;;  %s36_s17 = ssub.s32 %s1188_s12, %s1275_s15 }
   0xf   : > { %p46_p0 = scmp.ne.s32.totalorder %s1184_s11, %s1180_s10  ;;  %p37_p1 = scmp.eq.s32.totalorder %s36_s17, 0 }
  0x10   : > { %p47_p2 = scmp.eq.s32.totalorder %s1188_s12, 0  ;;  %p52_p3 = scmp.ne.s32.totalorder %s1180_s10, %s1176_s30 }
  0x11   : > { %p53_p4 = scmp.eq.s32.totalorder %s1271_s13, 0  ;;  %p228_p7 = scmp.eq.s32.totalorder %s1271_s13, 1 }
  0x12   : > { %s1287_s18 = scalar_select %p37_p1, %s1184_s11, %s39_s16  }
  0x13   : > { %p1289_p5 = por %p47_p2, %p46_p0  ;;  %p1293_p6 = por %p53_p4, %p52_p3 }
  0x14   : > { %1585 = sst [smem:[#allocation17_spill]] %s1287_s18  ;;  %p234_p8 = scmp.eq.s32.totalorder %s858_s14, 1 }
  0x15   : > { %p939_p10 = scmp.lt.s32.totalorder %s1188_s12, 2  ;;  %p1300_p11 = por %p228_p7, %p46_p0 }
  0x16   : > { %p1304_p12 = por %p234_p8, %p52_p3  ;;  %s1309_s23 = sand.u32 1, %s1184_s11  }
  0x17   : > { %s912_s24 = sshll.u32 %s1188_s12, 4  ;;  %s861_s25 = sshll.u32 %s1309_s23, 4 }
  0x18   : > { %s1589_s22 = scalar_select %p1304_p12, 1, 0 }
  0x19   : > { %s1591_s0 = sld [smem:[#allocation19_spill]]  ;;  %s302_s14 = scalar_lea.vmem [#allocation2], %s861_s25 }
  0x1a   : > { %1590 = sst [smem:[#allocation18_spill]] %s1589_s22  ;;  %s311_s16 = sshll.u32 %s302_s14, 4  ;;  %s312_s16 = int_to_ptr.vmem [resolvable:$true] %s311_s16 }
  0x1b   : > { %p1318_p13 = pnand %p939_p10, %p1289_p5  ;;  %p867_p0 = scmp.ge.s32.totalorder %s1188_s12, 1 }
  0x1c   : > { %p336_p1 = scmp.lt.s32.totalorder %s1188_s12, 3  ;;  %s299_s18 = scalar_lea.sflag [#allocation3], %s1309_s23 }
  0x1d   : > { %p1030_p3 = pneg %p1318_p13 }
  0x1f   : > { %s307_s28 = scalar_lea.hbm %s1591_s0, %s912_s24  ;;  %s1033_s27 = scalar_lea.hbm %s1591_s0, 32 }
  0x20   : > { %s309_s29 = sshll.u32 %s307_s28, 4  ;;  %s310_s29 = int_to_ptr.hbm [resolvable:$true] %s309_s29 }
  0x21   : > { %s1026_s11 = sshra.s32 %s310_s29, 4  ;;  %s1027_s11 = int_to_ptr.hbm [resolvable:$true] %s1026_s11 }
  0x22   : > { %s1028_s15 = scalar_lea.hbm %s1027_s11, 16  ;;  %p1034_p5 = scmp.lt.s32.totalorder %s1027_s11, %s1591_s0 }
  0x23   : > { %p1029_p2 = scmp.ne.s32.totalorder %s1027_s11, %s1028_s15  ;;  %p1035_p8 = scmp.lt.s32.totalorder %s1033_s27, %s1028_s15 }
  0x25   : > { %p1031_p4 = pnand %p1030_p3, %p1029_p2  ;;  %p1036_p10 = por %p1035_p8, %p1034_p5 }
  0x27   : > { %p1032_p7 = pneg %p1031_p4 }
  0x29   : > { %p1037_p9 = pnand %p1036_p10, %p1032_p7 }
  0x2b   : > { %1040 = shalt.err (!%p1037_p9)
}
  0x2c   : > { %928 = dma.hbm_to_vmem [thread:$0]  (!%p1318_p13), %s310_s29, 256, %s312_s16, %s299_s18  }
  0x2d   : > { %p1342_p2 = pnand %p867_p0, %p336_p1  ;;  %s327_s11 = scalar_lea.hbm %s1567_s1, %s912_s24 }
  0x2e   : > { %s329_s15 = sshll.u32 %s327_s11, 4  ;;  %s322_s27 = scalar_lea.vmem [#allocation5], %s861_s25  ;;  %s330_s15 = int_to_ptr.hbm [resolvable:$true] %s329_s15 }
  0x2f   : > { %s331_s14 = sshll.u32 %s322_s27, 4  ;;  %s319_s0 = scalar_lea.sflag [#allocation6], %s1309_s23  ;;  %s332_s14 = int_to_ptr.vmem [resolvable:$true] %s331_s14 }
  0x30   : > { %s1056_s22 = sshra.s32 %s330_s15, 4  ;;  %s1063_s16 = scalar_lea.hbm %s1567_s1, 32  ;;  %s1057_s22 = int_to_ptr.hbm [resolvable:$true] %s1056_s22 }
  0x31   : > { %s1058_s30 = scalar_lea.hbm %s1057_s22, 16  ;;  %p1064_p4 = scmp.lt.s32.totalorder %s1057_s22, %s1567_s1 }
  0x32   : > { %p1059_p9 = scmp.ne.s32.totalorder %s1057_s22, %s1058_s30  ;;  %p1065_p7 = scmp.lt.s32.totalorder %s1063_s16, %s1058_s30 }
  0x34   : > { %p1061_p0 = pnand %p1059_p9, %p1030_p3  ;;  %p1066_p5 = por %p1065_p7, %p1064_p4 }
  0x36   : > { %p1062_p1 = pneg %p1061_p0 }
  0x38   : > { %p1067_p8 = pnand %p1066_p5, %p1062_p1 }
  0x3a   : > { %1070 = shalt.err (!%p1067_p8)
}
  0x3b   : > { %931 = dma.hbm_to_vmem [thread:$0]  (!%p1318_p13), %s330_s15, 256, %s332_s14, %s319_s0  }
  0x3c   : > { %340 = sbr.rel (%p1342_p2) target bundleno = 633 (0x279), region = 52  ;;  %s1364_s23 = sand.u32 (!%p1342_p2), 1, %s1180_s10  }
  0x3d   : > { %s1367_s25 = sshll.u32 (!%p1342_p2), %s1364_s23, 4  ;;  %s343_s22 = scalar_lea.sflag (!%p1342_p2), [#allocation3], %s1364_s23 }
  0x3e   : > { %s346_s30 = scalar_lea.vmem (!%p1342_p2), [#allocation2], %s1367_s25 }
  0x41   : > { %1159 = dma.done.wait (%p1293_p6), %s343_s22, 256  }
  0x42   : > { %1161 = vsyncadd (%p1293_p6), %s343_s22, 4294967040  ;;  %s353_s0 = scalar_lea.sflag [#allocation6], %s1364_s23  ;;  %s356_s17 = scalar_lea.vmem [#allocation5], %s1367_s25 }
  0x43   : > { %1163 = dma.done.wait (%p1293_p6), %s353_s0, 256  }
  0x44   : > { %1165 = vsyncadd (%p1293_p6), %s353_s0, 4294967040  ;;  %v1190_v0 = vmov 0   ;;  %v446_v1 = vld [vmem:[%s1568_s2] sm:$0xff]  ;;  %v454_v5 = vld [vmem:[%s346_s30 + $0x8] sm:$0xff]  ;;  %s1191_s20 = smov 15   ;;  %s1192_s27 = smov 112   ;;  %v403_v14 = vlaneseq }
  0x45   : > { %983 = vset.pattern.permute.xlu0 %v1190_v0  ;;  %1024 = vset.pattern.permute.xlu1 %v1190_v0  ;;  %v447_v2 = vld [vmem:[%s1569_s3] sm:$0xff]  ;;  %s1193_s14 = smov 111   ;;  %s1194_s18 = smov 16   ;;  %vm589_vm5 = vcmask 1043456   ;;  %vm1199_vm11 = vmmov 1  }
  0x46   : > { %1025 = vset.pattern.permute.xlu2 %v1190_v0  ;;  %457 = vperm.xlu0 %983, %v446_v1   ;;  %v453_v4 = vld [vmem:[%s346_s30] sm:$0xff]  ;;  %s1195_s29 = smov 127   ;;  %s1196_s16 = smov 113   ;;  %v1397_v15 = vand.u32 127, %v403_v14 }
  0x47   : > { %s1197_s26 = smov 17   ;;  %s1198_s24 = smov 1   ;;  %v448_v20 = vld [vmem:[%s1571_s5] sm:$0xff] }
  0x48   : > { %v405_v16 = vadd.s32 128, %v1397_v15  ;;  %v410_v19 = vand.u32 15, %v1397_v15  ;;  %v449_v21 = vld [vmem:[%s1572_s6] sm:$0xff]  ;;  %vm566_vm2 = vcmp.lt.s32.totalorder %v1397_v15, 111  ;;  %vm553_vm7 = vcmp.lt.s32.totalorder %v1397_v15, 112  ;;  %s871_s0 = sshll.u32 %s1364_s23, 3 }
  0x49   : > { %vm540_vm9 = vcmp.lt.s32.totalorder %v1397_v15, 113  ;;  %vm527_vm13 = vcmp.lt.s32.totalorder %v1397_v15, 127  ;;  %vm430_vm15 = vcmp.ge.s32.totalorder %v1397_v15, 16  ;;  %s916_s19 = sshll.u32 %s1271_s13, 3 }
  0x4a   : > { %v417_v17 = vand.u32 15, %v405_v16  ;;  %vm441_vm1 = vcmp.lt.s32.totalorder %v405_v16, 240  ;;  %vm1412_vm3 = vcmp.ne.s32.totalorder %v410_v19, 15  ;;  %vm1430_vm8 = vcmp.ne.s32.totalorder %v410_v19, 0  ;;  %s727_s15 = scalar_lea.hbm %s1575_s9, %s916_s19 }
  0x4b   : > { %vm872_vm12 = vmpackc.low %vm1199_vm11, %vm1430_vm8 }
  0x4c   : > { %vm1407_vm0 = vcmp.ne.s32.totalorder %v417_v17, 15  ;;  %vm1423_vm6 = vcmp.ne.s32.totalorder %v417_v17, 0 }
  0x4d   : > { %vm445_vm4 = vmand %vm441_vm1, %vm1407_vm0 }
  0x4e   : > { %464 = vperm.xlu0 %983, %v447_v2   ;;  %vm443_vm10 = vmand %vm441_vm1, %vm1423_vm6 }
  0x4f   : > { %vm885_vm14 = vmpackc.low %vm441_vm1, %vm443_vm10 }
  0x50   : > { %vm1459_vm1 = vmand %vm430_vm15, %vm1412_vm3 }
  0x51   : > { %vm891_vm10 = vmpackc.low %vm1423_vm6, %vm1407_vm0 }
  0xb8   : > { %v458_v3 = vpop.permute.xlu0 %457 }
  0xb9   : > { %v460_v6 = vmul.f32 %v458_v3, %v453_v4  ;;  %v461_v7 = vmul.f32 %v458_v3, %v454_v5 }
  0xc0   : > { %v465_v8 = vpop.permute.xlu0 %464 }
  0xc1   : > { %v1387_v9 = vadd.f32 %v465_v8, %v460_v6  ;;  %v1389_v10 = vadd.f32 %v465_v8, %v461_v7 }
  0xc3   : > { %v469_v11 = vmax.f32 %v1387_v9, 0.0  ;;  %v470_v12 = vmax.f32 %v1389_v10, 0.0 }
  0xc5   : > { %v1004_v13 = vpack.i.bf16 %v470_v12, %v469_v11 }
  0xc7   : > { %1005 = vrot.lane.b32.xlu0 %v1004_v13, %s1191_s20  ;;  %995 = vrot.lane.b32.xlu2 %v1004_v13, %s1192_s27  ;;  %s696_s20 = scalar_lea.sflag [#allocation4], %s1364_s23 }
  0xc8   : > { %985 = vrot.lane.b32.xlu1 %v1004_v13, %s1193_s14 }
  0xcf   : > { %1020 = vrot.lane.b32.xlu0 %v1004_v13, %s1194_s18  ;;  %1000 = vrot.lane.b32.xlu2 %v1004_v13, %s1195_s29  ;;  %s915_s18 = sshll.u32 %s1271_s13, 4  ;;  %s1106_s13 = scalar_lea.hbm %s1574_s8, 32 }
  0xd0   : > { %990 = vrot.lane.b32.xlu1 %v1004_v13, %s1196_s16 }
  0xd7   : > { %1015 = vrot.lane.b32.xlu2 %v1004_v13, %s1197_s26  ;;  %s712_s26 = scalar_lea.hbm %s1574_s8, %s915_s18 }
  0xd8   : > { %1010 = vrot.lane.b32.xlu1 %v1004_v13, %s1198_s24  ;;  %s394_s24 = scalar_lea.vmem [#allocation7], %s1367_s25  ;;  %s716_s30 = sshll.u32 %s712_s26, 4  ;;  %s717_s30 = int_to_ptr.hbm [resolvable:$true] %s716_s30 }
  0xd9   : > { %s714_s22 = sshll.u32 %s394_s24, 4  ;;  %s715_s22 = int_to_ptr.vmem [resolvable:$true] %s714_s22 }
  0xdf   : > { %631 = vperm.xlu2 %1025, %v449_v21  }
  0xe0   : > { %624 = vperm.xlu1 %1024, %v448_v20  }
 0x121   : > { %v996_v18 = vpop.permute.xlu2 %995 }
 0x122   : > { %v998_v36 = vunpack.i.h.bf16 %v996_v18  ;;  %v997_v37 = vunpack.i.l.bf16 %v996_v18  ;;  %v450_v18 = vld [vmem:[%s1570_s4] sm:$0xf] }
 0x124   : > { %v554_v46 = vsel %vm553_vm7, %v997_v37, %v998_v36  ;;  %v555_v49 = vsel %vm553_vm7, %v998_v36, %v997_v37  ;;  %vm514_vm7 = vcmp.lt.s32.totalorder %v1397_v15, 1  ;;  %v683_v37 = vld [vmem:[%s356_s17] sm:$0xff] }
 0x129   : > { %v1001_v32 = vpop.permute.xlu2 %1000 }
 0x12a   : > { %v1003_v42 = vunpack.i.h.bf16 %v1001_v32  ;;  %v1002_v43 = vunpack.i.l.bf16 %v1001_v32 }
 0x12c   : > { %v528_v52 = vsel %vm527_vm13, %v1002_v43, %v1003_v42  ;;  %v529_v54 = vsel %vm527_vm13, %v1003_v42, %v1002_v43  ;;  %vm434_vm13 = vmand %vm430_vm15, %vm1430_vm8 }
 0x12d   : > { %v876_v61 = vpack.c.bf16 %v528_v52, %v469_v11  ;;  %v889_v62 = vpack.c.bf16 %v529_v54, %v470_v12 }
 0x131   : > { %v1016_v57 = vpop.permute.xlu2 %1015 }
 0x132   : > { %v1018_v3 = vunpack.i.h.bf16 %v1016_v57  ;;  %v1017_v4 = vunpack.i.l.bf16 %v1016_v57 }
 0x139   : > { %v1419_v29 = vpop.permute.xlu0 %1005 }
 0x13a   : > { %v986_v23 = vpop.permute.xlu1 %985  ;;  %v1008_v58 = vunpack.i.h.bf16 %v1419_v29  ;;  %v1007_v59 = vunpack.i.l.bf16 %v1419_v29  ;;  %v914_v29 = vld [vmem:[%s1573_s7] sm:$0x30] }
 0x13b   : > { %v988_v24 = vunpack.i.h.bf16 %v986_v23  ;;  %v987_v25 = vunpack.i.l.bf16 %v986_v23 }
 0x13d   : > { %v567_v27 = vsel %vm566_vm2, %v987_v25, %v988_v24  ;;  %v568_v28 = vsel %vm566_vm2, %v988_v24, %v987_v25  ;;  %vm1451_vm2 = vmpackc.low %vm1412_vm3, %vm1199_vm11 }
 0x13e   : > { %v573_v30 = vsel %vm1412_vm3, %v567_v27, 0.0  ;;  %v574_v31 = vsel %vm445_vm4, %v568_v28, 0.0  ;;  %vm888_vm4 = vmpackc.low %vm1407_vm0, %vm1199_vm11  ;;  %vm501_vm3 = vcmp.lt.s32.totalorder %v1397_v15, 15  ;;  %v900_v28 = vld [vmem:[%s1573_s7] sm:$0xf] }
 0x13f   : > { %v583_v33 = vpack.c.bf16 %v573_v30, %v573_v30  ;;  %v584_v34 = vpack.c.bf16 %v574_v31, %v574_v31  ;;  %v503_v5 = vsel %vm501_vm3, %v1008_v58, %v1007_v59  ;;  %v502_v7 = vsel %vm501_vm3, %v1007_v59, %v1008_v58  ;;  %vm881_vm0 = vmpackc.low %vm430_vm15, %vm434_vm13 }
 0x140   : > { %v901_v36 = vor.u32 %v914_v29, %v900_v28 }
 0x141   : > { %v591_v38 = vsel %vm589_vm5, %v583_v33, 0  ;;  %v594_v39 = vsel %vm589_vm5, %v584_v34, 0  ;;  %v1021_v55 = vpop.permute.xlu0 %1020 }
 0x142   : > { %v991_v41 = vpop.permute.xlu1 %990  ;;  %599 = vmatpush.bf16.msra.mxu0 %v591_v38  ;;  %612 = vmatpush.bf16.msra.mxu1 %v594_v39  ;;  %v1023_v63 = vunpack.i.h.bf16 %v1021_v55  ;;  %v1022_v0 = vunpack.i.l.bf16 %v1021_v55  ;;  %v684_v38 = vld [vmem:[%s356_s17 + $0x8] sm:$0xff]  ;;  %s1100_s17 = sshra.s32 %s717_s30, 4  ;;  %s1101_s17 = int_to_ptr.hbm [resolvable:$true] %s1100_s17 }
 0x143   : > { %v993_v44 = vunpack.i.h.bf16 %v991_v41  ;;  %v992_v45 = vunpack.i.l.bf16 %v991_v41  ;;  %s1102_s25 = scalar_lea.hbm %s1101_s17, 16  ;;  %p1107_p10 = scmp.lt.s32.totalorder %s1101_s17, %s1574_s8 }
 0x144   : > { %p1103_p6 = scmp.ne.s32.totalorder %s1101_s17, %s1102_s25  ;;  %p1108_p2 = scmp.lt.s32.totalorder %s1106_s13, %s1102_s25 }
 0x145   : > { %v541_v47 = vsel %vm540_vm9, %v992_v45, %v993_v44  ;;  %v542_v48 = vsel %vm540_vm9, %v993_v44, %v992_v45  ;;  %vm878_vm9 = vmpackc.low %vm1430_vm8, %vm1459_vm1  ;;  %vm585_vm8 = vcmask 588800  }
 0x146   : > { %v873_v50 = vpack.c.bf16 %v554_v46, %v541_v47  ;;  %v886_v51 = vpack.c.bf16 %v555_v49, %v542_v48  ;;  %p1104_p13 = pnand %p1103_p6, %p1300_p11  ;;  %p1109_p9 = por %p1108_p2, %p1107_p10 }
 0x148   : > { %874 = vmatpush.bf16.msk.msra.mxu0 %vm872_vm12, %v873_v50  ;;  %887 = vmatpush.bf16.msk.msra.mxu1 %vm885_vm14, %v886_v51  ;;  %vm488_vm12 = vcmp.lt.s32.totalorder %v1397_v15, 16  ;;  %vm475_vm14 = vcmp.lt.s32.totalorder %v1397_v15, 17  ;;  %v632_v15 = vpop.permute.xlu2 %631  ;;  %p1105_p3 = pneg %p1104_p13 }
 0x149   : > { %v490_v11 = vsel %vm488_vm12, %v1023_v63, %v1022_v0  ;;  %v489_v12 = vsel %vm488_vm12, %v1022_v0, %v1023_v63  ;;  %v477_v13 = vsel %vm475_vm14, %v1018_v3, %v1017_v4  ;;  %v476_v14 = vsel %vm475_vm14, %v1017_v4, %v1018_v3 }
 0x14a   : > { %v1011_v60 = vpop.permute.xlu1 %1010  ;;  %v882_v16 = vpack.c.bf16 %v490_v11, %v477_v13  ;;  %v895_v17 = vpack.c.bf16 %v489_v12, %v476_v14  ;;  %p1110_p0 = pnand %p1109_p9, %p1105_p3 }
 0x14b   : > { %v1013_v1 = vunpack.i.h.bf16 %v1011_v60  ;;  %v1012_v2 = vunpack.i.l.bf16 %v1011_v60 }
 0x14c   : > { %877 = vmatpush.bf16.msk.msra.mxu0 %vm1451_vm2, %v876_v61  ;;  %890 = vmatpush.bf16.msk.msra.mxu1 %vm888_vm4, %v889_v62  ;;  %vm894_vm2 = vmpackc.low %vm1199_vm11, %vm1423_vm6  ;;  %vm645_vm6 = vcmask 64512  }
 0x14d   : > { %v516_v6 = vsel %vm514_vm7, %v1013_v1, %v1012_v2  ;;  %v515_v8 = vsel %vm514_vm7, %v1012_v2, %v1013_v1 }
 0x14e   : > { %v879_v9 = vpack.c.bf16 %v516_v6, %v503_v5  ;;  %v892_v10 = vpack.c.bf16 %v515_v8, %v502_v7 }
 0x150   : > { %880 = vmatpush.bf16.msk.msra.mxu0 %vm878_vm9, %v879_v9  ;;  %893 = vmatpush.bf16.msk.msra.mxu1 %vm891_vm10, %v892_v10 }
 0x152   : > { %v625_v19 = vpop.permute.xlu1 %624 }
 0x154   : > { %883 = vmatpush.bf16.msk.msra.mxu0 %vm881_vm0, %v882_v16  ;;  %896 = vmatpush.bf16.msk.msra.mxu1 %vm894_vm2, %v895_v17 }
 0x157   : > { %884 = vmatmul.msk.bf16.vlgmr.msra.gmra.mxu0 %vm585_vm8, %v450_v18  ;;  %897 = vmatmul.msk.bf16.vlgmr.msra.gmra.mxu1 %vm585_vm8, %v450_v18 }
 0x1d4   : > { %v605_v20 = vpop.f32.mrf.mxu0  ;;  %v618_v21 = vpop.f32.mrf.mxu1 }
 0x1d5   : > { %v627_v22 = vmul.f32 %v625_v19, %v605_v20  ;;  %v628_v23 = vmul.f32 %v625_v19, %v618_v21 }
 0x1d7   : > { %v634_v24 = vadd.f32 %v632_v15, %v627_v22  ;;  %v635_v25 = vadd.f32 %v632_v15, %v628_v23 }
 0x1d9   : > { %v636_v26 = vmax.f32 %v634_v24, 0.0  ;;  %v637_v27 = vmax.f32 %v635_v25, 0.0 }
 0x1db   : > { %v638_v30 = vpack.c.bf16 %v636_v26, %v636_v26  ;;  %v639_v31 = vpack.c.bf16 %v637_v27, %v637_v27 }
 0x1dc   : > { %v607_v32 = vpop.f32.mrf.mxu0  ;;  %v620_v33 = vpop.f32.mrf.mxu1 }
 0x1dd   : > { %v650_v34 = vsel %vm589_vm5, %v638_v30, 0  ;;  %v653_v35 = vsel %vm589_vm5, %v639_v31, 0 }
 0x1de   : > { %662 = vmatpush.bf16.msra.mxu2 %v650_v34  ;;  %676 = vmatpush.bf16.msra.mxu3 %v653_v35 }
 0x1e1   : > { %902 = vmatmul.msk.bf16.vlgmr.msra.gmra.mxu2 %vm645_vm6, %v901_v36  ;;  %903 = vmatmul.msk.bf16.vlgmr.msra.gmra.mxu3 %vm645_vm6, %v901_v36 }
 0x264   : > { %v664_v39 = vpop.f32.mrf.mxu2  ;;  %v678_v40 = vpop.f32.mrf.mxu3 }
 0x265   : > { %v685_v41 = vadd.f32 %v683_v37, %v664_v39  ;;  %v686_v42 = vadd.f32 %v684_v38, %v678_v40 }
 0x267   : > { %687 = vst [vmem:[%s394_s24] sm:$0xff] %v685_v41 }
 0x268   : > { %688 = vst [vmem:[%s394_s24 + $0x8] sm:$0xff] %v686_v42 }
 0x269   : > { %1113 = shalt.err (!%p1110_p0)
}
 0x26a   : > { %921 = dma.vmem_to_hbm [thread:$0]  (%p1300_p11), %s715_s22, 256, %s717_s30, %s696_s20  }
 0x26b   : > { %s401_s16 = scalar_lea.vmem [#allocation8], %s871_s0  ;;  %s731_s24 = sshll.u32 %s727_s15, 4  ;;  %s732_s24 = int_to_ptr.hbm [resolvable:$true] %s731_s24 }
 0x26c   : > { %s729_s26 = sshll.u32 %s401_s16, 4  ;;  %v680_v43 = vpop.f32.mrf.mxu3  ;;  %v666_v45 = vpop.f32.mrf.mxu2  ;;  %s701_s19 = scalar_lea.sflag [#allocation9], %s1364_s23  ;;  %s730_s26 = int_to_ptr.vmem [resolvable:$true] %s729_s26 }
 0x26d   : > { %v691_v44 = vrot.slane %v680_v43, 4  ;;  %s1128_s28 = sshra.s32 %s732_s24, 4  ;;  %s1134_s0 = scalar_lea.hbm %s1575_s9, 16  ;;  %s1129_s28 = int_to_ptr.hbm [resolvable:$true] %s1128_s28 }
 0x26e   : > { %s1130_s11 = scalar_lea.hbm %s1129_s28, 8  ;;  %p1135_p5 = scmp.lt.s32.totalorder %s1129_s28, %s1575_s9 }
 0x26f   : > { %v692_v46 = vsel %vm589_vm5, %v666_v45, %v691_v44  ;;  %p1131_p1 = scmp.ne.s32.totalorder %s1129_s28, %s1130_s11  ;;  %p1136_p8 = scmp.lt.s32.totalorder %s1134_s0, %s1130_s11 }
 0x270   : > { %694 = vst [vmem:[%s401_s16] sm:$0xff] %v692_v46 }
 0x271   : > { %p1132_p4 = pnand %p1131_p1, %p1300_p11  ;;  %p1137_p6 = por %p1136_p8, %p1135_p5 }
 0x273   : > { %p1133_p7 = pneg %p1132_p4 }
 0x275   : > { %p1138_p13 = pnand %p1137_p6, %p1133_p7 }
 0x277   : > { %1141 = shalt.err (!%p1138_p13)
}
 0x278   : > { %922 = dma.vmem_to_hbm [thread:$0]  (%p1300_p11), %s730_s26, 128, %s732_s24, %s701_s19  }
 0x279 PF: > { %s1606_s23 = sld [smem:[#allocation14_spill]]  ;;  %p1608_p3 = scmp.ge.s32.totalorder %s1188_s12, 2 }
 0x27b   : > { %p933_p10 = pnand %p1608_p3, %p1304_p12 }
 0x27d   : > { %p934_p2 = pneg %p933_p10 }
 0x27f   : > { %s743_s25 = sand.u32 1, %s1606_s23  }
 0x280   : > { %s744_s27 = scalar_lea.sflag [#allocation4], %s743_s25 }
 0x281   : > { %1167 = dma.done.wait (%p934_p2), %s744_s27, 256  }
 0x282   : > { %1169 = vsyncadd (%p934_p2), %s744_s27, 4294967040  ;;  %s754_s14 = scalar_lea.sflag [#allocation9], %s743_s25 }
 0x283   : > { %1171 = dma.done.wait (%p934_p2), %s754_s14, 128  }
 0x284   : > { %1173 = vsyncadd (%p934_p2), %s754_s14, 4294967168  ;;  %s1609_s12 = sld [smem:[#allocation16_spill]]  ;;  %s1612_s30 = smov %s1180_s10 }
 0x285   : > { %s1610_s13 = sld [smem:[#allocation15_spill]] }
 0x286   : > { %s1611_s11 = sld [smem:[#allocation17_spill]] }
 0x28a   : > { %p29_p11 = scmp.ge.s32.totalorder %s1609_s12, 4  }
 0x28b   : > { %s1613_s10 = smov %s1610_s13 }
 0x28c   :  { %31 = sbr.rel (!%p29_p11) target bundleno = 11 (0xb), region = 127 }
 0x291   :  { %760 = vsyncpa [#allocation3], 1 }
 0x292   :  { %762 = vsyncpa [#allocation3 + $0x1], 1 }
 0x293   :  { %763 = vsyncpa [#allocation6], 1 }
 0x294   :  { %765 = vsyncpa [#allocation6 + $0x1], 1 }
 0x295   :  { %766 = vsyncpa [#allocation4], 1 }
 0x296   :  { %768 = vsyncpa [#allocation4 + $0x1], 1 }
 0x297   :  { %769 = vsyncpa [#allocation9], 1 }
 0x298   :  { %771 = vsyncpa [#allocation9 + $0x1], 1 }

</bundles_post_ra>
